<compile_context>
chip_gen: v5e
topology: v5e:2x2
jax: 0.10.0
libtpu: 0.0.40
codegen_flags: <defaults>
</compile_context>

<pallas_src>
import functools

import jax
import jax.numpy as jnp
from jax import lax
from jax.experimental import pallas as pl
from jax.experimental.pallas import tpu as pltpu


def _round_up(a, b):
    return (a + b - 1) // b * b


def _self_attention_kernel(x_ref, wq_ref, bq_ref, wk_ref, bk_ref, wv_ref, bv_ref,
                           o_ref, q_scr, k_scr, v_scr, *, valid_hw, needs_mask):
    qi = pl.program_id(1)
    tq = o_ref.shape[2]           # query tile size

    # ---- once per batch element: Q/K/V projection over the full (padded) HW ----
    @pl.when(qi == 0)
    def _():
        xb = x_ref[0]                                                      # (C, HWp) bf16
        # Three separate dots keep the f32 temporary peak at C x HWp (not
        # (2*128+C) x HWp); only the real C//8 (rounded to 8) Q/K rows are projected.
        q_p = jnp.dot(wq_ref[...], xb, preferred_element_type=jnp.float32) + bq_ref[...]
        q_scr[...] = jnp.transpose(q_p.astype(jnp.bfloat16))               # (HWp, CQK)
        k_p = jnp.dot(wk_ref[...], xb, preferred_element_type=jnp.float32) + bk_ref[...]
        k_scr[...] = k_p.astype(jnp.bfloat16)                              # (CQK, HWp)
        v_p = jnp.dot(wv_ref[...], xb, preferred_element_type=jnp.float32) + bv_ref[...]
        v_scr[...] = v_p.astype(jnp.bfloat16)                              # (C, HWp)

    # ---- per query tile ----
    q_start = pl.multiple_of(qi * tq, tq)
    q_t = q_scr[pl.ds(q_start, tq), :]                                     # (TQ, CQK) bf16

    # energy[i, j] = <q_i, k_j>   (padded Q/K channels are exactly zero)
    energy = jnp.dot(q_t, k_scr[...],
                     preferred_element_type=jnp.float32)                   # (TQ, HWp) f32
    if needs_mask:
        col = lax.broadcasted_iota(jnp.int32, energy.shape, 1)
        energy = jnp.where(col < valid_hw, energy, -jnp.inf)               # mask padded keys

    # numerically-stable softmax statistics in f32; normalization is deferred
    m = jnp.max(energy, axis=-1, keepdims=True)
    p = jnp.exp(energy - m)                                                # (TQ, HWp) f32
    l = jnp.sum(p, axis=-1, keepdims=True)                                 # (TQ, 1)  f32

    # out[c, i] = (sum_j v[c, j] * p[i, j]) / l[i]   (NT dot, f32 accumulation)
    out_ct = lax.dot_general(v_scr[...], p.astype(jnp.bfloat16),
                             (((1,), (1,)), ((), ())),
                             preferred_element_type=jnp.float32)           # (C, TQ)
    inv_l = pl.reciprocal(l, approx=True)                                  # (TQ, 1)
    o_ref[0] = (out_ct * jnp.transpose(inv_l)).astype(o_ref.dtype)         # lane-dense store


def self_attention_pallas(x_nchw, wq, bq, wk, bk, wv, bv, *, tq=None):
    """x_nchw: (N, C, H, W) f32.  Conv weights in PyTorch layout:
       wq/wk: (C//8, C), wv: (C, C), biases 1-D.  Returns (N, C, H, W) f32.
       tq: query-tile size; default is chip-aware (512 on v5e/v6e, 256 on v7x)."""
    n, c, h, w = x_nchw.shape
    hw = h * w
    c8 = wq.shape[0]
    cqk = max(_round_up(c8, 8), 8)     # real Q/K channels rounded up to a sublane tile

    try:
        vmem_cap = int(pltpu.get_tpu_info().vmem_capacity_bytes)
    except Exception:
        vmem_cap = 64 * 1024 * 1024    # conservative (v7x) fallback

    if tq is None:
        tq = 512 if vmem_cap >= (96 << 20) else 256
        if hw >= 8192:
            tq = min(tq, 256 if vmem_cap >= (96 << 20) else 128)
    tq = max(128, min(_round_up(tq, 128), _round_up(hw, 128)))
    hw_pad = _round_up(hw, tq)
    n_q = hw_pad // tq
    needs_mask = hw_pad != hw

    # Q/K projection weights zero-padded from c8 to cqk rows (exact); bf16 MXU operands.
    wq_p = jnp.zeros((cqk, c), jnp.float32).at[:c8].set(wq).astype(jnp.bfloat16)
    wk_p = jnp.zeros((cqk, c), jnp.float32).at[:c8].set(wk).astype(jnp.bfloat16)
    wv_p = wv.astype(jnp.bfloat16)
    bq_p = jnp.zeros((cqk, 1), jnp.float32).at[:c8, 0].set(bq)
    bk_p = jnp.zeros((cqk, 1), jnp.float32).at[:c8, 0].set(bk)
    bv_p = bv.astype(jnp.float32).reshape(c, 1)

    # Free reshape + wrapper-side bf16 cast (halves HBM read + x VMEM block).
    x_flat = x_nchw.reshape(n, c, hw).astype(jnp.bfloat16)
    if needs_mask:
        x_flat = jnp.pad(x_flat, ((0, 0), (0, 0), (0, hw_pad - hw)))

    # Rough VMEM budget (double-buffered blocks + scratch + temporaries), capped
    # against the queried physical VMEM of this generation.
    lane = 128
    est = (2 * c * hw_pad * 2                      # x block (bf16, double-buffered)
           + 2 * c * tq * 4                        # out block (f32)
           + 2 * (2 * cqk + c) * max(c, lane) * 2  # weights (lane-padded bf16)
           + 2 * (2 * cqk + c) * lane * 4          # biases (lane-padded f32)
           + hw_pad * lane * 2                     # Q scratch (lane-padded)
           + _round_up(cqk, 16) * hw_pad * 2       # K scratch (bf16)
           + _round_up(c, 16) * hw_pad * 2         # V scratch (bf16)
           + 3 * tq * hw_pad * 4                   # energy / p / mask temporaries
           + 2 * max(cqk, c) * hw_pad * 4)         # qi==0 projection temporaries
    vmem_limit = int(min(max(int(1.4 * est), 32 << 20), int(0.85 * vmem_cap)))

    kernel = functools.partial(_self_attention_kernel,
                               valid_hw=hw, needs_mask=needs_mask)

    out_flat = pl.pallas_call(
        kernel,
        out_shape=jax.ShapeDtypeStruct((n, c, hw_pad), jnp.float32),
        grid_spec=pltpu.PrefetchScalarGridSpec(
            num_scalar_prefetch=0,
            grid=(n, n_q),
            in_specs=[
                pl.BlockSpec((1, c, hw_pad), lambda b, q: (b, 0, 0)),  # x (per batch, bf16)
                pl.BlockSpec((cqk, c), lambda b, q: (0, 0)),           # Wq
                pl.BlockSpec((cqk, 1), lambda b, q: (0, 0)),           # bq
                pl.BlockSpec((cqk, c), lambda b, q: (0, 0)),           # Wk
                pl.BlockSpec((cqk, 1), lambda b, q: (0, 0)),           # bk
                pl.BlockSpec((c, c), lambda b, q: (0, 0)),             # Wv
                pl.BlockSpec((c, 1), lambda b, q: (0, 0)),             # bv
            ],
            out_specs=pl.BlockSpec((1, c, tq), lambda b, q: (b, 0, q)),  # lane-dense
            scratch_shapes=[
                pltpu.VMEM((hw_pad, cqk), jnp.bfloat16),   # Q (token-major)
                pltpu.VMEM((cqk, hw_pad), jnp.bfloat16),   # K
                pltpu.VMEM((c, hw_pad), jnp.bfloat16),     # V
            ],
        ),
        compiler_params=pltpu.CompilerParams(
            dimension_semantics=("parallel", "arbitrary"),
            vmem_limit_bytes=vmem_limit),
    )(x_flat, wq_p, bq_p, wk_p, bk_p, wv_p, bv_p)

    out = out_flat[:, :, :hw] if needs_mask else out_flat
    return out.reshape(n, c, h, w).astype(x_nchw.dtype)


def self_attention_ref(x_nchw, wq, bq, wk, bk, wv, bv):
    """Pure-JAX f32 reference mirroring the PyTorch forward."""
    n, c, h, w = x_nchw.shape
    hw = h * w
    x_flat = x_nchw.reshape(n, c, hw)                              # (N, C, HW)
    q = jnp.einsum('oc,ncp->nop', wq, x_flat) + bq[None, :, None]  # (N, C8, HW)
    k = jnp.einsum('oc,ncp->nop', wk, x_flat) + bk[None, :, None]
    v = jnp.einsum('oc,ncp->nop', wv, x_flat) + bv[None, :, None]  # (N, C, HW)
    energy = jnp.einsum('ncp,ncq->npq', q, k)                      # (N, HW, HW)
    attn = jax.nn.softmax(energy, axis=-1)
    out = jnp.einsum('ncq,npq->ncp', v, attn)                      # (N, C, HW)
    return out.reshape(n, c, h, w)


if __name__ == "__main__":
    # Small deterministic example: N=2, C=32 (C//8 = 4), H=W=16 -> HW=256,
    # tq=128 -> 2 query tiles per batch element (exercises the tiling path).
    N, C, H, W = 2, 32, 16, 16
    C8 = C // 8

    key = jax.random.PRNGKey(0)
    kx, kx2, kwq, kbq, kwk, kbk, kwv, kbv = jax.random.split(key, 8)
    x = jax.random.normal(kx, (N, C, H, W), dtype=jnp.float32)
    wq = jax.random.normal(kwq, (C8, C), dtype=jnp.float32) * 0.1
    bq = jax.random.normal(kbq, (C8,), dtype=jnp.float32) * 0.1
    wk = jax.random.normal(kwk, (C8, C), dtype=jnp.float32) * 0.1
    bk = jax.random.normal(kbk, (C8,), dtype=jnp.float32) * 0.1
    wv = jax.random.normal(kwv, (C, C), dtype=jnp.float32) * 0.1
    bv = jax.random.normal(kbv, (C,), dtype=jnp.float32) * 0.1

    out = self_attention_pallas(x, wq, bq, wk, bk, wv, bv, tq=128)
    out = jax.block_until_ready(out)
    ref = self_attention_ref(x, wq, bq, wk, bk, wv, bv)
    assert out.shape == (N, C, H, W)
    # bf16 MXU operands + approx reciprocal -> looser tolerance than pure-f32.
    assert jnp.allclose(out, ref, atol=3e-2, rtol=3e-2), "mismatch vs reference"

    # Ragged spatial size: HW=225 -> padded to 256 with masked key columns.
    H2 = W2 = 15
    x2 = jax.random.normal(kx2, (N, C, H2, W2), dtype=jnp.float32)
    out2 = jax.block_until_ready(
        self_attention_pallas(x2, wq, bq, wk, bk, wv, bv, tq=128))
    ref2 = self_attention_ref(x2, wq, bq, wk, bk, wv, bv)
    assert out2.shape == (N, C, H2, W2)
    assert jnp.allclose(out2, ref2, atol=3e-2, rtol=3e-2), "mismatch vs reference (ragged)"

    print("KERNEL_OK")
</pallas_src>

<mosaic_0001>
module attributes {stable_mosaic.version = 11 : i64} {
  func.func @_self_attention_kernel(%arg0: i32, %arg1: i32, %arg2: memref<1x32x256xbf16, #tpu.memory_space<vmem>>, %arg3: memref<8x32xbf16, #tpu.memory_space<vmem>>, %arg4: memref<8x1xf32, #tpu.memory_space<vmem>>, %arg5: memref<8x32xbf16, #tpu.memory_space<vmem>>, %arg6: memref<8x1xf32, #tpu.memory_space<vmem>>, %arg7: memref<32x32xbf16, #tpu.memory_space<vmem>>, %arg8: memref<32x1xf32, #tpu.memory_space<vmem>>, %arg9: memref<1x32x128xf32, #tpu.memory_space<vmem>>, %arg10: memref<256x8xbf16, #tpu.memory_space<vmem>>, %arg11: memref<8x256xbf16, #tpu.memory_space<vmem>>, %arg12: memref<32x256xbf16, #tpu.memory_space<vmem>>) attributes {dimension_semantics = [#tpu.dimension_semantics<parallel>, #tpu.dimension_semantics<arbitrary>], iteration_bounds = array<i64: 2, 2>, scalar_prefetch = 0 : i64, scratch_operands = 3 : i64, tpu.core_type = #tpu.core_type<tc>, window_params = [{transform_indices = @transform_0, window_bounds = array<i64: 1, 32, 256>}, {pipeline_mode = #tpu.pipeline_mode<synchronous>, transform_indices = @transform_1, window_bounds = array<i64: 8, 32>}, {pipeline_mode = #tpu.pipeline_mode<synchronous>, transform_indices = @transform_2, window_bounds = array<i64: 8, 1>}, {pipeline_mode = #tpu.pipeline_mode<synchronous>, transform_indices = @transform_3, window_bounds = array<i64: 8, 32>}, {pipeline_mode = #tpu.pipeline_mode<synchronous>, transform_indices = @transform_4, window_bounds = array<i64: 8, 1>}, {pipeline_mode = #tpu.pipeline_mode<synchronous>, transform_indices = @transform_5, window_bounds = array<i64: 32, 32>}, {pipeline_mode = #tpu.pipeline_mode<synchronous>, transform_indices = @transform_6, window_bounds = array<i64: 32, 1>}, {transform_indices = @transform_7, window_bounds = array<i64: 1, 32, 128>}]} {
    %c0_i32 = arith.constant 0 : i32
    %0 = arith.cmpi eq, %arg1, %c0_i32 : i32
    %1 = arith.extui %0 : i1 to i32
    %c0_i32_0 = arith.constant 0 : i32
    %2 = arith.cmpi ne, %1, %c0_i32_0 : i32
    scf.if %2 {
      %c0_11 = arith.constant 0 : index
      %c0_12 = arith.constant 0 : index
      %c0_13 = arith.constant 0 : index
      %26 = vector.load %arg2[%c0_11, %c0_12, %c0_13] : memref<1x32x256xbf16, #tpu.memory_space<vmem>>, vector<1x32x256xbf16>
      %27 = vector.shape_cast %26 : vector<1x32x256xbf16> to vector<32x256xbf16>
      %c0_14 = arith.constant 0 : index
      %c0_15 = arith.constant 0 : index
      %28 = vector.load %arg3[%c0_14, %c0_15] : memref<8x32xbf16, #tpu.memory_space<vmem>>, vector<8x32xbf16>
      %cst_16 = arith.constant dense<0.000000e+00> : vector<8x256xf32>
      %29 = tpu.matmul %28, %27, %cst_16 {dimension_numbers = #tpu.dot_dimension_numbers<[1], [0], [0], [1], [0, 0, 1, 1], [], []>} : vector<8x32xbf16>, vector<32x256xbf16>, vector<8x256xf32> -> vector<8x256xf32>
      %c0_17 = arith.constant 0 : index
      %c0_18 = arith.constant 0 : index
      %30 = vector.load %arg4[%c0_17, %c0_18] : memref<8x1xf32, #tpu.memory_space<vmem>>, vector<8x1xf32>
      %31 = vector.broadcast %30 : vector<8x1xf32> to vector<8x256xf32>
      %32 = arith.addf %29, %31 : vector<8x256xf32>
      %33 = arith.truncf %32 : vector<8x256xf32> to vector<8x256xbf16>
      %34 = tpu.transpose %33, [1, 0] : vector<8x256xbf16> -> vector<256x8xbf16>
      %c0_19 = arith.constant 0 : index
      %c0_20 = arith.constant 0 : index
      %35 = vector.load %arg10[%c0_19, %c0_20] : memref<256x8xbf16, #tpu.memory_space<vmem>>, vector<256x8xbf16>
      tpu.vector_store %arg10[%c0_19, %c0_20], %34 {strides = array<i32>} : memref<256x8xbf16, #tpu.memory_space<vmem>>, vector<256x8xbf16>,
      %c0_21 = arith.constant 0 : index
      %c0_22 = arith.constant 0 : index
      %36 = vector.load %arg5[%c0_21, %c0_22] : memref<8x32xbf16, #tpu.memory_space<vmem>>, vector<8x32xbf16>
      %cst_23 = arith.constant dense<0.000000e+00> : vector<8x256xf32>
      %37 = tpu.matmul %36, %27, %cst_23 {dimension_numbers = #tpu.dot_dimension_numbers<[1], [0], [0], [1], [0, 0, 1, 1], [], []>} : vector<8x32xbf16>, vector<32x256xbf16>, vector<8x256xf32> -> vector<8x256xf32>
      %c0_24 = arith.constant 0 : index
      %c0_25 = arith.constant 0 : index
      %38 = vector.load %arg6[%c0_24, %c0_25] : memref<8x1xf32, #tpu.memory_space<vmem>>, vector<8x1xf32>
      %39 = vector.broadcast %38 : vector<8x1xf32> to vector<8x256xf32>
      %40 = arith.addf %37, %39 : vector<8x256xf32>
      %41 = arith.truncf %40 : vector<8x256xf32> to vector<8x256xbf16>
      %c0_26 = arith.constant 0 : index
      %c0_27 = arith.constant 0 : index
      %42 = vector.load %arg11[%c0_26, %c0_27] : memref<8x256xbf16, #tpu.memory_space<vmem>>, vector<8x256xbf16>
      tpu.vector_store %arg11[%c0_26, %c0_27], %41 {strides = array<i32>} : memref<8x256xbf16, #tpu.memory_space<vmem>>, vector<8x256xbf16>,
      %c0_28 = arith.constant 0 : index
      %c0_29 = arith.constant 0 : index
      %43 = vector.load %arg7[%c0_28, %c0_29] : memref<32x32xbf16, #tpu.memory_space<vmem>>, vector<32x32xbf16>
      %cst_30 = arith.constant dense<0.000000e+00> : vector<32x256xf32>
      %44 = tpu.matmul %43, %27, %cst_30 {dimension_numbers = #tpu.dot_dimension_numbers<[1], [0], [0], [1], [0, 0, 1, 1], [], []>} : vector<32x32xbf16>, vector<32x256xbf16>, vector<32x256xf32> -> vector<32x256xf32>
      %c0_31 = arith.constant 0 : index
      %c0_32 = arith.constant 0 : index
      %45 = vector.load %arg8[%c0_31, %c0_32] : memref<32x1xf32, #tpu.memory_space<vmem>>, vector<32x1xf32>
      %46 = vector.broadcast %45 : vector<32x1xf32> to vector<32x256xf32>
      %47 = arith.addf %44, %46 : vector<32x256xf32>
      %48 = arith.truncf %47 : vector<32x256xf32> to vector<32x256xbf16>
      %c0_33 = arith.constant 0 : index
      %c0_34 = arith.constant 0 : index
      %49 = vector.load %arg12[%c0_33, %c0_34] : memref<32x256xbf16, #tpu.memory_space<vmem>>, vector<32x256xbf16>
      tpu.vector_store %arg12[%c0_33, %c0_34], %48 {strides = array<i32>} : memref<32x256xbf16, #tpu.memory_space<vmem>>, vector<32x256xbf16>,
    } else {
    }
    %c128_i32 = arith.constant 128 : i32
    %3 = arith.muli %arg1, %c128_i32 : i32
    %4 = tpu.assume_multiple %3, 128 : i32
    %5 = arith.index_cast %4 : i32 to index
    %c0 = arith.constant 0 : index
    %6 = vector.load %arg10[%5, %c0] : memref<256x8xbf16, #tpu.memory_space<vmem>>, vector<128x8xbf16>
    %c0_1 = arith.constant 0 : index
    %c0_2 = arith.constant 0 : index
    %7 = vector.load %arg11[%c0_1, %c0_2] : memref<8x256xbf16, #tpu.memory_space<vmem>>, vector<8x256xbf16>
    %cst = arith.constant dense<0.000000e+00> : vector<128x256xf32>
    %8 = tpu.matmul %6, %7, %cst {dimension_numbers = #tpu.dot_dimension_numbers<[1], [0], [0], [1], [0, 0, 1, 1], [], []>} : vector<128x8xbf16>, vector<8x256xbf16>, vector<128x256xf32> -> vector<128x256xf32>
    %cst_3 = arith.constant dense<0xFF800000> : vector<128xf32>
    %9 = vector.multi_reduction <maximumf>, %8, %cst_3 [1] : vector<128x256xf32> to vector<128xf32>
    %10 = vector.shape_cast %9 : vector<128xf32> to vector<128x1xf32>
    %11 = vector.broadcast %10 : vector<128x1xf32> to vector<128x256xf32>
    %12 = arith.subf %8, %11 : vector<128x256xf32>
    %13 = math.exp %12 : vector<128x256xf32>
    %cst_4 = arith.constant dense<0.000000e+00> : vector<128xf32>
    %14 = vector.multi_reduction <add>, %13, %cst_4 [1] : vector<128x256xf32> to vector<128xf32>
    %15 = vector.shape_cast %14 : vector<128xf32> to vector<128x1xf32>
    %c0_5 = arith.constant 0 : index
    %c0_6 = arith.constant 0 : index
    %16 = vector.load %arg12[%c0_5, %c0_6] : memref<32x256xbf16, #tpu.memory_space<vmem>>, vector<32x256xbf16>
    %17 = arith.truncf %13 : vector<128x256xf32> to vector<128x256xbf16>
    %cst_7 = arith.constant dense<0.000000e+00> : vector<32x128xf32>
    %18 = tpu.matmul %16, %17, %cst_7 {dimension_numbers = #tpu.dot_dimension_numbers<[1], [1], [0], [0], [0, 0, 1, 0], [], []>} : vector<32x256xbf16>, vector<128x256xbf16>, vector<32x128xf32> -> vector<32x128xf32>
    %19 = tpu.reciprocal %15 {approx = true} : vector<128x1xf32> -> vector<128x1xf32>
    %20 = tpu.transpose %19, [1, 0] : vector<128x1xf32> -> vector<1x128xf32>
    %21 = vector.broadcast %20 : vector<1x128xf32> to vector<32x128xf32>
    %22 = arith.mulf %18, %21 : vector<32x128xf32>
    %c0_8 = arith.constant 0 : index
    %c0_9 = arith.constant 0 : index
    %c0_10 = arith.constant 0 : index
    %23 = vector.load %arg9[%c0_8, %c0_9, %c0_10] : memref<1x32x128xf32, #tpu.memory_space<vmem>>, vector<1x32x128xf32>
    %24 = vector.shape_cast %23 : vector<1x32x128xf32> to vector<32x128xf32>
    %25 = vector.shape_cast %22 : vector<32x128xf32> to vector<1x32x128xf32>
    tpu.vector_store %arg9[%c0_8, %c0_9, %c0_10], %25 {strides = array<i32>} : memref<1x32x128xf32, #tpu.memory_space<vmem>>, vector<1x32x128xf32>,
    return
  }
  func.func @transform_0(%arg0: i32, %arg1: i32) -> (i32, i32, i32) {
    %c0_i32 = arith.constant 0 : i32
    %c0_i32_0 = arith.constant 0 : i32
    %c0_i32_1 = arith.constant 0 : i32
    return %arg0, %c0_i32, %c0_i32_0 : i32, i32, i32
  }
  func.func @transform_1(%arg0: i32, %arg1: i32) -> (i32, i32) {
    %c0_i32 = arith.constant 0 : i32
    %c0_i32_0 = arith.constant 0 : i32
    %c0_i32_1 = arith.constant 0 : i32
    return %c0_i32, %c0_i32_0 : i32, i32
  }
  func.func @transform_2(%arg0: i32, %arg1: i32) -> (i32, i32) {
    %c0_i32 = arith.constant 0 : i32
    %c0_i32_0 = arith.constant 0 : i32
    %c0_i32_1 = arith.constant 0 : i32
    return %c0_i32, %c0_i32_0 : i32, i32
  }
  func.func @transform_3(%arg0: i32, %arg1: i32) -> (i32, i32) {
    %c0_i32 = arith.constant 0 : i32
    %c0_i32_0 = arith.constant 0 : i32
    %c0_i32_1 = arith.constant 0 : i32
    return %c0_i32, %c0_i32_0 : i32, i32
  }
  func.func @transform_4(%arg0: i32, %arg1: i32) -> (i32, i32) {
    %c0_i32 = arith.constant 0 : i32
    %c0_i32_0 = arith.constant 0 : i32
    %c0_i32_1 = arith.constant 0 : i32
    return %c0_i32, %c0_i32_0 : i32, i32
  }
  func.func @transform_5(%arg0: i32, %arg1: i32) -> (i32, i32) {
    %c0_i32 = arith.constant 0 : i32
    %c0_i32_0 = arith.constant 0 : i32
    %c0_i32_1 = arith.constant 0 : i32
    return %c0_i32, %c0_i32_0 : i32, i32
  }
  func.func @transform_6(%arg0: i32, %arg1: i32) -> (i32, i32) {
    %c0_i32 = arith.constant 0 : i32
    %c0_i32_0 = arith.constant 0 : i32
    %c0_i32_1 = arith.constant 0 : i32
    return %c0_i32, %c0_i32_0 : i32, i32
  }
  func.func @transform_7(%arg0: i32, %arg1: i32) -> (i32, i32, i32) {
    %c0_i32 = arith.constant 0 : i32
    %c0_i32_0 = arith.constant 0 : i32
    return %arg0, %c0_i32, %arg1 : i32, i32, i32
  }
}

</mosaic_0001>

<bundles_post_ra>
// kernel: tpu_custom_call.1
= control target key start
LH: loop header
LB: loop body
LE: loop exit
PB: predicated region body
PF: predicated region fallthrough
CT: control target
= control target key end

     0   :  { %s2320_s0 = inlined_call_operand.hbm [shape: bf16[2,32,256], index: 0, kind: input, shape index: {}]   ;;  %s2321_s1 = inlined_call_operand.vmem [shape: bf16[8,32], index: 1, kind: input, shape index: {}]   ;;  %s2322_s2 = inlined_call_operand.vmem [shape: f32[8,1], index: 2, kind: input, shape index: {}]   ;;  %s2323_s3 = inlined_call_operand.vmem [shape: bf16[8,32], index: 3, kind: input, shape index: {}]   ;;  %s2324_s4 = inlined_call_operand.vmem [shape: f32[8,1], index: 4, kind: input, shape index: {}]   ;;  %s2325_s5 = inlined_call_operand.vmem [shape: bf16[32,32], index: 5, kind: input, shape index: {}]   ;;  %s2326_s6 = inlined_call_operand.vmem [shape: f32[32,1], index: 6, kind: input, shape index: {}]   ;;  %s2327_s7 = inlined_call_operand.hbm [shape: f32[2,32,256], index: 7, kind: output, shape index: {}]  }
   0x1   :  { %2335 = sst [smem:[#allocation18_spill]] %s2327_s7 }
   0x2   :  { %12 = vsyncpa [#allocation6], 0 }
   0x3   :  { %14 = vsyncpa [#allocation6 + $0x1], 0 }
   0x4   :  { %15 = vsyncpa [#allocation7], 0 }
   0x5   :  { %17 = vsyncpa [#allocation7 + $0x1], 0  ;;  %s1847_s24 = smov 0   ;;  %s1849_s25 = smov 0  }
   0x6   :  { %s1851_s26 = smov 0   ;;  %s1853_s27 = smov 0  }
   0x7   :  { %s1855_s28 = smov 0   ;;  %s1857_s29 = smov 0  }
   0x8   :  { %s1859_s30 = smov 0   ;;  %s1861_s8 = smov 0  }
   0x9   :  { %s1863_s9 = smov 0   ;;  %s1865_s10 = smov 0  }
   0xa   :  { %s1867_s11 = smov 0  }
   0xb LB: > { %2336 = sst [smem:[#allocation11_spill]] %s1791_s9  ;;  %s1307_s12 = sadd.s32 4294967295, %s1799_s11   ;;  %s1799_s11 = sphi %s1867_s11, %s23_s11   ;;  %s1795_s10 = sphi %s1865_s10, %s2355_s10   ;;  %s1791_s9 = sphi %s1863_s9, %s2354_s9   ;;  %s1787_s8 = sphi %s1861_s8, %s2353_s8   ;;  %s1783_s30 = sphi %s1859_s30, %s2352_s30   ;;  %s1779_s29 = sphi %s1857_s29, %s2361_s29   ;;  %s1775_s28 = sphi %s1855_s28, %s2360_s28   ;;  %s1771_s27 = sphi %s1853_s27, %s2359_s27   ;;  %s1767_s26 = sphi %s1851_s26, %s2358_s26   ;;  %s1763_s25 = sphi %s1849_s25, %s2357_s25   ;;  %s1759_s24 = sphi %s1847_s24, %s2356_s24  }
   0xc   : > { %2337 = sst [smem:[#allocation12_spill]] %s1795_s10  ;;  %s1308_s13 = sadd.s32 4294967294, %s1799_s11  }
   0xd   : > { %s32_s14 = sadd.s32 1, %s1791_s9  ;;  %s35_s15 = sadd.s32 1, %s1795_s10 }
   0xe   : > { %p33_p0 = scmp.ge.s32.totalorder %s32_s14, 2  ;;  %s42_s16 = sadd.s32 1, %s1779_s29 }
   0xf   : > { %p49_p1 = scmp.ne.s32.totalorder %s1779_s29, %s1775_s28  ;;  %p50_p2 = scmp.eq.s32.totalorder %s1799_s11, 0 }
  0x10   : > { %s2363_s14 = smov (%p33_p0, %s32_s14), 0  ;;  %s2365_s15 = smov (!%p33_p0, %s35_s15), %s1795_s10 }
  0x11   : > { %2338 = sst [smem:[#allocation13_spill]] %s2363_s14  ;;  %p1911_p3 = por %p50_p2, %p49_p1 }
  0x12   : > { %p55_p4 = scmp.ne.s32.totalorder %s1775_s28, %s1771_s27  ;;  %p37_p5 = scmp.ge.s32.totalorder %s2365_s15, 2 }
  0x13   : > { %p56_p6 = scmp.eq.s32.totalorder %s1307_s12, 0  ;;  %s192_s18 = ssub.s32 %s1791_s9, %s2363_s14 }
  0x14   : > { %s196_s19 = sadd.s32 1, %s1767_s26  ;;  %s2367_s15 = smov (%p37_p5, %s2365_s15), 0 }
  0x15   : > { %2340 = sst [smem:[#allocation14_spill]] %s2367_s15  ;;  %p1921_p7 = por %p56_p6, %p55_p4 }
  0x16   : > { %p206_p8 = scmp.ne.s32.totalorder %s1767_s26, %s1763_s25  ;;  %s39_s21 = ssub.s32 %s1795_s10, %s2367_s15 }
  0x17   : > { %p207_p9 = scmp.eq.s32.totalorder %s1307_s12, 3  ;;  %p40_p10 = scmp.eq.s32.totalorder %s39_s21, 0 }
  0x18   : > { %s193_s22 = sor.u32 %s192_s18, %s39_s21  ;;  %p212_p13 = scmp.ne.s32.totalorder %s1763_s25, %s1759_s24 }
  0x19   : > { %p194_p11 = scmp.eq.s32.totalorder %s193_s22, 0  ;;  %p1929_p12 = por %p207_p9, %p206_p8 }
  0x1a   : > { %s1934_s27 = scalar_select %p40_p10, %s1779_s29, %s42_s16  }
  0x1b   : > { %s2342_s23 = scalar_select %p1929_p12, 1, 0 }
  0x1c   : > { %2344 = sst [smem:[#allocation16_spill]] %s1934_s27  ;;  %p213_p0 = scmp.eq.s32.totalorder %s1308_s13, 3 }
  0x1d   : > { %2343 = sst [smem:[#allocation15_spill]] %s2342_s23  ;;  %p1452_p1 = scmp.lt.s32.totalorder %s1799_s11, 4 }
  0x1e   : > { %s1937_s14 = scalar_select %p194_p11, %s1767_s26, %s196_s19  }
  0x1f   : > { %p1942_p2 = por %p213_p0, %p212_p13  ;;  %s251_s12 = sand.u32 1, %s1779_s29  }
  0x20   : > { %2345 = sst [smem:[#allocation17_spill]] %s1937_s14  ;;  %s1311_s18 = sshll.u32 %s251_s12, 5 }
  0x21   : > { %s1421_s21 = sshll.u32 %s1795_s10, 5  ;;  %s255_s16 = scalar_lea.vmem [#allocation5], %s1311_s18 }
  0x22   : > { %s260_s23 = scalar_lea.hbm %s2320_s0, %s1421_s21  ;;  %s263_s27 = sshll.u32 %s255_s16, 4  ;;  %s264_s27 = int_to_ptr.vmem [resolvable:$true] %s263_s27 }
  0x23   : > { %s261_s7 = sshll.u32 %s260_s23, 4  ;;  %p1445_p4 = pnand %p1452_p1, %p1911_p3  ;;  %s262_s7 = int_to_ptr.hbm [resolvable:$true] %s261_s7 }
  0x24   : > { %p1314_p5 = scmp.ge.s32.totalorder %s1799_s11, 1  ;;  %s252_s13 = scalar_lea.sflag [#allocation6], %s251_s12 }
  0x25   : > { %s1801_s19 = smov 128   ;;  %s1802_s14 = smov 8  }
  0x26   : > { %1447 = dma.hbm_to_vmem [thread:$0]  (!%p1445_p4), %s262_s7, 512, %s264_s27, %s252_s13, %s1801_s19, %s1801_s19, %s1802_s14  }
  0x27   : > { %p271_p6 = scmp.lt.s32.totalorder %s1799_s11, 5 }
  0x29   : > { %p272_p8 = pnand %p1314_p5, %p271_p6 }
  0x2a   : > { %s277_s10 = sand.u32 (!%p272_p8), 1, %s1775_s28  }
  0x2b   : > { %275 = sbr.rel (%p272_p8) target bundleno = 1204 (0x4b4), region = 48  ;;  %s1315_s15 = sshll.u32 (!%p272_p8), %s277_s10, 5 }
  0x2c   : > { %s278_s21 = scalar_lea.sflag (!%p272_p8), [#allocation6], %s277_s10  ;;  %s281_s18 = scalar_lea.vmem (!%p272_p8), [#allocation5], %s1315_s15 }
  0x30   : > { %1750 = dma.done.wait (%p1921_p7), %s278_s21, 512  }
  0x31   : > { %1752 = vsyncadd (%p1921_p7), %s278_s21, 4294966784  ;;  %s310_s17 = sand.u32 1, %s1763_s25   ;;  %p1317_p3 = scmp.ne.s32.totalorder %s1783_s30, 0 }
  0x32   : > { %s1316_s23 = sshll.u32 %s310_s17, 5 }
  0x33   : > { %s1963_s7 = scalar_lea.vmem [#allocation8], %s1316_s23  ;;  %317 = sbr.rel (%p1317_p3) target bundleno = 502 (0x1f6), region = 56 }
  0x38   : > { %v1328_v0 = vld [vmem:[%s281_s18 + $0x10] sm:$0xf]  ;;  %v1425_v1 = vld [vmem:[%s281_s18 + $0x14] sm:$0xf0]  ;;  %v1424_v2 = vld [vmem:[%s281_s18 + $0x14] sm:$0xf] }
  0x39   : > { %v1329_v3 = vor.u32 %v1425_v1, %v1328_v0  ;;  %v1330_v4 = vld [vmem:[%s281_s18 + $0x18] sm:$0xf0]  ;;  %v1320_v5 = vld [vmem:[%s281_s18] sm:$0xf]  ;;  %v1423_v6 = vld [vmem:[%s281_s18 + $0x4] sm:$0xf0] }
  0x3a   : > { %v1333_v7 = vor.u32 %v1424_v2, %v1330_v4  ;;  %v1422_v8 = vld [vmem:[%s281_s18 + $0x4] sm:$0xf]  ;;  %v1322_v9 = vld [vmem:[%s281_s18 + $0x8] sm:$0xf0]  ;;  %v1321_v10 = vor.u32 %v1423_v6, %v1320_v5  ;;  %v323_v11 = vld [vmem:[%s2322_s2] sm:$0xff]  ;;  %v1803_v13 = vmov 0  }
  0x3b   : > { %359 = vmatpush.bf16.msra.mxu2 %v1329_v3  ;;  %638 = vmatpush.bf16.msra.mxu0 %v1329_v3  ;;  %v1325_v12 = vor.u32 %v1422_v8, %v1322_v9  ;;  %v322_v14 = vld [vmem:[%s2321_s1] sm:$0xf]  ;;  %vm349_vm0 = vcmask 261120   ;;  %v1427_v19 = vld [vmem:[%s2325_s5 + $0x8] sm:$0xff]  ;;  %v595_v20 = vld [vmem:[%s2326_s6 + $0x18] sm:$0xff]  ;;  %vm517_vm1 = vcmask 60416  }
  0x3c   : > { %372 = vmatpush.bf16.msra.mxu3 %v1333_v7  ;;  %1548 = vset.pattern.permute.xlu0 %v1803_v13  ;;  %v1426_v15 = vld [vmem:[%s2325_s5] sm:$0xff]  ;;  %v593_v30 = vld [vmem:[%s2326_s6 + $0x8] sm:$0xff]  ;;  %v594_v31 = vld [vmem:[%s2326_s6 + $0x10] sm:$0xff] }
  0x3d   : > { %326 = vperm.xlu0 %1548, %v323_v11   ;;  %657 = vmatpush.bf16.msra.mxu1 %v1333_v7  ;;  %v550_v16 = vld [vmem:[%s2323_s3] sm:$0xf] }
  0x3e   : > { %1549 = vset.pattern.permute.xlu1 %v1803_v13  ;;  %1550 = vset.pattern.permute.xlu2 %v1803_v13  ;;  %v551_v17 = vld [vmem:[%s2324_s4] sm:$0xff] }
  0x3f   : > { %360 = vmatpush.bf16.msra.mxu2 %v1321_v10  ;;  %639 = vmatpush.bf16.msra.mxu0 %v1321_v10  ;;  %v592_v18 = vld [vmem:[%s2326_s6] sm:$0xff] }
  0x40   : > { %373 = vmatpush.bf16.msra.mxu3 %v1325_v12  ;;  %554 = vperm.xlu1 %1549, %v551_v17  }
  0x41   : > { %658 = vmatpush.bf16.msra.mxu1 %v1325_v12  ;;  %603 = vperm.xlu2 %1550, %v593_v30  }
  0x42   : > { %1334 = vmatmul.msk.bf16.vlgmr.msra.gmra.mxu2 %vm349_vm0, %v322_v14  ;;  %1346 = vmatmul.msk.bf16.vlgmr.msra.gmra.mxu0 %vm349_vm0, %v1426_v15 }
  0x43   : > { %566 = vmatpush.bf16.msrb.mxu2 %v1329_v3  ;;  %1335 = vmatmul.msk.bf16.vlgmr.msra.gmra.mxu3 %vm349_vm0, %v322_v14 }
  0x44   : > { %579 = vmatpush.bf16.msrb.mxu3 %v1333_v7  ;;  %1348 = vmatmul.msk.bf16.vlgmr.msra.gmra.mxu1 %vm349_vm0, %v1426_v15 }
  0x47   : > { %567 = vmatpush.bf16.msrb.mxu2 %v1321_v10 }
  0x48   : > { %580 = vmatpush.bf16.msrb.mxu3 %v1325_v12  ;;  %598 = vperm.xlu1 %1549, %v592_v18  }
  0x49   : > { %608 = vperm.xlu2 %1550, %v594_v31  }
  0x50   : > { %613 = vperm.xlu1 %1549, %v595_v20  }
  0x52   : > { %1336 = vmatmul.msk.bf16.vlgmr.msrb.gmra.mxu2 %vm349_vm0, %v550_v16  ;;  %1347 = vmatmul.msk.bf16.gmra.mxu0 %vm349_vm0, %v1427_v19 }
  0x53   : > { %1337 = vmatmul.msk.bf16.vlgmr.msrb.gmra.mxu3 %vm349_vm0, %v550_v16 }
  0x54   : > { %1349 = vmatmul.msk.bf16.gmra.mxu1 %vm349_vm0, %v1427_v19 }
  0xaf   : > { %v327_v21 = vpop.permute.xlu0 %326 }
  0xb2   : > { %v555_v5 = vpop.permute.xlu1 %554 }
  0xba   : > { %v599_v13 = vpop.permute.xlu1 %598 }
  0xbf   : > { %v641_v62 = vpop.f32.mrf.mxu0 }
  0xc0   : > { %v642_v15 = vadd.f32 %v641_v62, %v599_v13 }
  0xc1   : > { %v660_v63 = vpop.f32.mrf.mxu1 }
  0xc2   : > { %v661_v16 = vadd.f32 %v660_v63, %v599_v13 }
  0xc5   : > { %v362_v22 = vpop.f32.mrf.mxu2 }
  0xc6   : > { %v363_v23 = vadd.f32 %v362_v22, %v327_v21  ;;  %v375_v24 = vpop.f32.mrf.mxu3  ;;  %v670_v22 = vpack.c.bf16 %v661_v16, %v642_v15 }
  0xc7   : > { %v376_v25 = vadd.f32 %v375_v24, %v327_v21  ;;  %v643_v6 = vpop.f32.mrf.mxu0  ;;  %v604_v21 = vpop.permute.xlu2 %603 }
  0xc8   : > { %v379_v26 = vpack.c.bf16 %v363_v23, %v363_v23  ;;  %v644_v23 = vadd.f32 %v643_v6, %v604_v21  ;;  %674 = vst [vmem:[#allocation4] sm:$0xff] %v670_v22 }
  0xc9   : > { %v380_v27 = vpack.c.bf16 %v376_v25, %v376_v25  ;;  %v662_v7 = vpop.f32.mrf.mxu1 }
  0xca   : > { %v663_v24 = vadd.f32 %v662_v7, %v604_v21 }
  0xcb   : > { %381 = vxpose.binary.xlu0.c.b16.start.end [1/2] (short) %v380_v27, %v379_v26, 128 }
  0xcc   : > { %v671_v27 = vpack.c.bf16 %v663_v24, %v644_v23 }
  0xcd   : > { %v364_v28 = vpop.f32.mrf.mxu2 }
  0xce   : > { %v377_v29 = vpop.f32.mrf.mxu3  ;;  %v614_v28 = vpop.permute.xlu1 %613  ;;  %675 = vst [vmem:[#allocation4 + $0x8] sm:$0xff] %v671_v27 }
  0xcf   : > { %v646_v14 = vpop.f32.mrf.mxu0 }
  0xd1   : > { %v665_v17 = vpop.f32.mrf.mxu1 }
  0xd5   : > { %v569_v29 = vpop.f32.mrf.mxu2 }
  0xd6   : > { %v570_v30 = vadd.f32 %v569_v29, %v555_v5  ;;  %v582_v31 = vpop.f32.mrf.mxu3 }
 0x177   : > { %v389_v32 = vpop.trf.xlu0 }
 0x178   : > { %v421_v33 = vunpack.c.l.b16 %v389_v32  ;;  %v422_v34 = vunpack.c.h.b16 %v389_v32  ;;  %v648_v32 = vpop.f32.mrf.mxu0 }
 0x17a   : > { %v453_v35 = vpack.c.b16 %v421_v33, %v421_v33  ;;  %v454_v36 = vpack.c.b16 %v422_v34, %v422_v34  ;;  %v583_v34 = vadd.f32 %v582_v31, %v555_v5 }
 0x17c   : > { %518 = vst.msk [vmem:[#allocation2] sm:$0xf] %vm517_vm1, %v453_v35  ;;  %v649_v35 = vadd.f32 %v648_v32, %v614_v28 }
 0x17d   : > { %519 = vst.msk [vmem:[#allocation2 + $0x4] sm:$0xf] %vm517_vm1, %v454_v36  ;;  %v667_v36 = vpop.f32.mrf.mxu1 }
 0x17f   : > { %v390_v37 = vpop.trf.xlu0 }
 0x180   : > { %v437_v38 = vunpack.c.l.b16 %v390_v37  ;;  %v438_v39 = vunpack.c.h.b16 %v390_v37 }
 0x182   : > { %v469_v40 = vpack.c.b16 %v437_v38, %v437_v38  ;;  %v470_v41 = vpack.c.b16 %v438_v39, %v438_v39  ;;  %v668_v39 = vadd.f32 %v667_v36, %v614_v28 }
 0x184   : > { %534 = vst.msk [vmem:[#allocation2 + $0x40] sm:$0xf] %vm517_vm1, %v469_v40  ;;  %v586_v40 = vpack.c.bf16 %v583_v34, %v570_v30 }
 0x185   : > { %535 = vst.msk [vmem:[#allocation2 + $0x44] sm:$0xf] %vm517_vm1, %v470_v41 }
 0x186   : > { %587 = vst [vmem:[#allocation3] sm:$0xff] %v586_v40 }
 0x187   : > { %v391_v42 = vpop.trf.xlu0 }
 0x188   : > { %v423_v43 = vunpack.c.l.b16 %v391_v42  ;;  %v424_v44 = vunpack.c.h.b16 %v391_v42 }
 0x18a   : > { %v455_v45 = vpack.c.b16 %v423_v43, %v423_v43  ;;  %v456_v46 = vpack.c.b16 %v424_v44, %v424_v44  ;;  %v673_v43 = vpack.c.bf16 %v668_v39, %v649_v35  ;;  %v571_v44 = vpop.f32.mrf.mxu2 }
 0x18c   : > { %520 = vst.msk [vmem:[#allocation2 + $0x8] sm:$0xf] %vm517_vm1, %v455_v45  ;;  %v584_v45 = vpop.f32.mrf.mxu3 }
 0x18d   : > { %521 = vst.msk [vmem:[#allocation2 + $0xc] sm:$0xf] %vm517_vm1, %v456_v46 }
 0x18e   : > { %677 = vst [vmem:[#allocation4 + $0x18] sm:$0xff] %v673_v43 }
 0x18f   : > { %v392_v47 = vpop.trf.xlu0 }
 0x190   : > { %v439_v48 = vunpack.c.l.b16 %v392_v47  ;;  %v440_v49 = vunpack.c.h.b16 %v392_v47 }
 0x192   : > { %v471_v50 = vpack.c.b16 %v439_v48, %v439_v48  ;;  %v472_v51 = vpack.c.b16 %v440_v49, %v440_v49  ;;  %v609_v49 = vpop.permute.xlu2 %608 }
 0x194   : > { %536 = vst.msk [vmem:[#allocation2 + $0x48] sm:$0xf] %vm517_vm1, %v471_v50  ;;  %v647_v50 = vadd.f32 %v646_v14, %v609_v49 }
 0x195   : > { %537 = vst.msk [vmem:[#allocation2 + $0x4c] sm:$0xf] %vm517_vm1, %v472_v51  ;;  %v666_v51 = vadd.f32 %v665_v17, %v609_v49 }
 0x197   : > { %v393_v52 = vpop.trf.xlu0 }
 0x198   : > { %v425_v53 = vunpack.c.l.b16 %v393_v52  ;;  %v426_v54 = vunpack.c.h.b16 %v393_v52 }
 0x19a   : > { %v457_v55 = vpack.c.b16 %v425_v53, %v425_v53  ;;  %v458_v56 = vpack.c.b16 %v426_v54, %v426_v54  ;;  %v672_v54 = vpack.c.bf16 %v666_v51, %v647_v50 }
 0x19c   : > { %522 = vst.msk [vmem:[#allocation2 + $0x10] sm:$0xf] %vm517_vm1, %v457_v55 }
 0x19d   : > { %523 = vst.msk [vmem:[#allocation2 + $0x14] sm:$0xf] %vm517_vm1, %v458_v56 }
 0x19e   : > { %676 = vst [vmem:[#allocation4 + $0x10] sm:$0xff] %v672_v54 }
 0x19f   : > { %v394_v57 = vpop.trf.xlu0 }
 0x1a0   : > { %v441_v58 = vunpack.c.l.b16 %v394_v57  ;;  %v442_v59 = vunpack.c.h.b16 %v394_v57 }
 0x1a2   : > { %v473_v60 = vpack.c.b16 %v441_v58, %v441_v58  ;;  %v474_v61 = vpack.c.b16 %v442_v59, %v442_v59 }
 0x1a4   : > { %538 = vst.msk [vmem:[#allocation2 + $0x50] sm:$0xf] %vm517_vm1, %v473_v60 }
 0x1a5   : > { %539 = vst.msk [vmem:[#allocation2 + $0x54] sm:$0xf] %vm517_vm1, %v474_v61 }
 0x1a7   : > { %v395_v0 = vpop.trf.xlu0 }
 0x1a8   : > { %v427_v1 = vunpack.c.l.b16 %v395_v0  ;;  %v428_v2 = vunpack.c.h.b16 %v395_v0 }
 0x1aa   : > { %v459_v3 = vpack.c.b16 %v427_v1, %v427_v1  ;;  %v460_v4 = vpack.c.b16 %v428_v2, %v428_v2 }
 0x1ac   : > { %524 = vst.msk [vmem:[#allocation2 + $0x18] sm:$0xf] %vm517_vm1, %v459_v3 }
 0x1ad   : > { %525 = vst.msk [vmem:[#allocation2 + $0x1c] sm:$0xf] %vm517_vm1, %v460_v4 }
 0x1af   : > { %v396_v8 = vpop.trf.xlu0 }
 0x1b0   : > { %v443_v9 = vunpack.c.l.b16 %v396_v8  ;;  %v444_v10 = vunpack.c.h.b16 %v396_v8 }
 0x1b2   : > { %v475_v11 = vpack.c.b16 %v443_v9, %v443_v9  ;;  %v476_v12 = vpack.c.b16 %v444_v10, %v444_v10 }
 0x1b4   : > { %540 = vst.msk [vmem:[#allocation2 + $0x58] sm:$0xf] %vm517_vm1, %v475_v11 }
 0x1b5   : > { %541 = vst.msk [vmem:[#allocation2 + $0x5c] sm:$0xf] %vm517_vm1, %v476_v12 }
 0x1b7   : > { %v397_v18 = vpop.trf.xlu0 }
 0x1b8   : > { %v429_v19 = vunpack.c.l.b16 %v397_v18  ;;  %v430_v20 = vunpack.c.h.b16 %v397_v18 }
 0x1ba   : > { %v461_v25 = vpack.c.b16 %v429_v19, %v429_v19  ;;  %v462_v26 = vpack.c.b16 %v430_v20, %v430_v20 }
 0x1bc   : > { %526 = vst.msk [vmem:[#allocation2 + $0x20] sm:$0xf] %vm517_vm1, %v461_v25 }
 0x1bd   : > { %527 = vst.msk [vmem:[#allocation2 + $0x24] sm:$0xf] %vm517_vm1, %v462_v26 }
 0x1bf   : > { %v398_v33 = vpop.trf.xlu0 }
 0x1c0   : > { %v445_v37 = vunpack.c.l.b16 %v398_v33  ;;  %v446_v38 = vunpack.c.h.b16 %v398_v33 }
 0x1c2   : > { %v477_v41 = vpack.c.b16 %v445_v37, %v445_v37  ;;  %v478_v42 = vpack.c.b16 %v446_v38, %v446_v38 }
 0x1c4   : > { %542 = vst.msk [vmem:[#allocation2 + $0x60] sm:$0xf] %vm517_vm1, %v477_v41 }
 0x1c5   : > { %543 = vst.msk [vmem:[#allocation2 + $0x64] sm:$0xf] %vm517_vm1, %v478_v42 }
 0x1c7   : > { %v399_v46 = vpop.trf.xlu0 }
 0x1c8   : > { %v431_v47 = vunpack.c.l.b16 %v399_v46  ;;  %v432_v48 = vunpack.c.h.b16 %v399_v46 }
 0x1ca   : > { %v463_v52 = vpack.c.b16 %v431_v47, %v431_v47  ;;  %v464_v53 = vpack.c.b16 %v432_v48, %v432_v48 }
 0x1cc   : > { %528 = vst.msk [vmem:[#allocation2 + $0x28] sm:$0xf] %vm517_vm1, %v463_v52 }
 0x1cd   : > { %529 = vst.msk [vmem:[#allocation2 + $0x2c] sm:$0xf] %vm517_vm1, %v464_v53 }
 0x1cf   : > { %v400_v55 = vpop.trf.xlu0 }
 0x1d0   : > { %v447_v56 = vunpack.c.l.b16 %v400_v55  ;;  %v448_v57 = vunpack.c.h.b16 %v400_v55 }
 0x1d2   : > { %v479_v58 = vpack.c.b16 %v447_v56, %v447_v56  ;;  %v480_v59 = vpack.c.b16 %v448_v57, %v448_v57 }
 0x1d4   : > { %544 = vst.msk [vmem:[#allocation2 + $0x68] sm:$0xf] %vm517_vm1, %v479_v58 }
 0x1d5   : > { %545 = vst.msk [vmem:[#allocation2 + $0x6c] sm:$0xf] %vm517_vm1, %v480_v59 }
 0x1d7   : > { %v401_v60 = vpop.trf.xlu0 }
 0x1d8   : > { %v433_v61 = vunpack.c.l.b16 %v401_v60  ;;  %v434_v62 = vunpack.c.h.b16 %v401_v60 }
 0x1da   : > { %v465_v63 = vpack.c.b16 %v433_v61, %v433_v61  ;;  %v466_v0 = vpack.c.b16 %v434_v62, %v434_v62 }
 0x1dc   : > { %530 = vst.msk [vmem:[#allocation2 + $0x30] sm:$0xf] %vm517_vm1, %v465_v63 }
 0x1dd   : > { %531 = vst.msk [vmem:[#allocation2 + $0x34] sm:$0xf] %vm517_vm1, %v466_v0 }
 0x1df   : > { %v402_v1 = vpop.trf.xlu0 }
 0x1e0   : > { %v449_v2 = vunpack.c.l.b16 %v402_v1  ;;  %v450_v3 = vunpack.c.h.b16 %v402_v1 }
 0x1e2   : > { %v481_v4 = vpack.c.b16 %v449_v2, %v449_v2  ;;  %v482_v5 = vpack.c.b16 %v450_v3, %v450_v3 }
 0x1e4   : > { %546 = vst.msk [vmem:[#allocation2 + $0x70] sm:$0xf] %vm517_vm1, %v481_v4 }
 0x1e5   : > { %547 = vst.msk [vmem:[#allocation2 + $0x74] sm:$0xf] %vm517_vm1, %v482_v5 }
 0x1e7   : > { %v403_v6 = vpop.trf.xlu0 }
 0x1e8   : > { %v435_v7 = vunpack.c.l.b16 %v403_v6  ;;  %v436_v8 = vunpack.c.h.b16 %v403_v6 }
 0x1ea   : > { %v467_v9 = vpack.c.b16 %v435_v7, %v435_v7  ;;  %v468_v10 = vpack.c.b16 %v436_v8, %v436_v8 }
 0x1ec   : > { %532 = vst.msk [vmem:[#allocation2 + $0x38] sm:$0xf] %vm517_vm1, %v467_v9 }
 0x1ed   : > { %533 = vst.msk [vmem:[#allocation2 + $0x3c] sm:$0xf] %vm517_vm1, %v468_v10 }
 0x1ef   : > { %v404_v11 = vpop.trf.xlu0 }
 0x1f0   : > { %v451_v12 = vunpack.c.l.b16 %v404_v11  ;;  %v452_v13 = vunpack.c.h.b16 %v404_v11 }
 0x1f2   : > { %v483_v14 = vpack.c.b16 %v451_v12, %v451_v12  ;;  %v484_v15 = vpack.c.b16 %v452_v13, %v452_v13 }
 0x1f4   : > { %548 = vst.msk [vmem:[#allocation2 + $0x78] sm:$0xf] %vm517_vm1, %v483_v14 }
 0x1f5   : > { %549 = vst.msk [vmem:[#allocation2 + $0x7c] sm:$0xf] %vm517_vm1, %v484_v15 }
 0x1f6 PF: > { %v699_v16 = vld [vmem:[#allocation3] sm:$0xff]  ;;  %s1350_s13 = sshll.u32 %s1783_s30, 7  ;;  %vm770_vm2 = vcmask 1043456   ;;  %vm745_vm3 = vcmask 64512   ;;  %s1417_s18 = sshll.u32 %s1787_s8, 3 }
 0x1f7   : > { %v741_v17 = vunpack.c.l.b16 %v699_v16  ;;  %v742_v18 = vunpack.c.h.b16 %v699_v16  ;;  %s679_s19 = sshra.s32 %s1350_s13, 3  ;;  %s1213_s23 = sadd.s32 %s1783_s30, %s1417_s18 }
 0x1f8   : > { %s1351_s15 = sshll.u32 %s679_s19, 2  ;;  %s1418_s10 = sshll.u32 %s1213_s23, 3 }
 0x1f9   : > { %v743_v19 = vpack.c.b16 %v741_v17, %v741_v17  ;;  %v744_v20 = vpack.c.b16 %v742_v18, %v742_v18  ;;  %s682_s21 = scalar_lea.vmem [#allocation2], %s1351_s15  ;;  %s2347_s27 = sld [smem:[#allocation18_spill]] }
 0x1fa   : > { %s1216_s16 = sshll.u32 %s1963_s7, 4  ;;  %s1203_s13 = scalar_lea.sflag [#allocation7], %s310_s17  ;;  %s1217_s16 = int_to_ptr.vmem [resolvable:$true] %s1216_s16 }
 0x1fb   : > { %v772_v21 = vsel %vm770_vm2, %v743_v19, 0  ;;  %v775_v22 = vsel %vm770_vm2, %v744_v20, 0 }
 0x1fc   : > { %v1428_v23 = vld [vmem:[%s682_s21] sm:$0xff]  ;;  %784 = vmatpush.bf16.msra.mxu0 %v772_v21  ;;  %833 = vmatpush.bf16.msra.mxu1 %v775_v22  ;;  %v1429_v24 = vld [vmem:[%s682_s21 + $0x8] sm:$0xff]  ;;  %v1430_v25 = vld [vmem:[%s682_s21 + $0x10] sm:$0xff] }
 0x1fd   : > { %v1431_v26 = vld [vmem:[%s682_s21 + $0x18] sm:$0xff]  ;;  %v1432_v27 = vld [vmem:[%s682_s21 + $0x20] sm:$0xff]  ;;  %v1433_v28 = vld [vmem:[%s682_s21 + $0x28] sm:$0xff] }
 0x1fe   : > { %v1434_v29 = vld [vmem:[%s682_s21 + $0x30] sm:$0xff]  ;;  %v1435_v30 = vld [vmem:[%s682_s21 + $0x38] sm:$0xff] }
 0x1ff   : > { %1384 = vmatmul.msk.bf16.vlgmr.msra.gmra.mxu0 %vm745_vm3, %v1428_v23  ;;  %1392 = vmatmul.msk.bf16.vlgmr.msra.gmra.mxu1 %vm745_vm3, %v1428_v23  ;;  %s2348_s12 = smov %s2347_s27  ;;  %s1215_s22 = scalar_lea.hbm %s2347_s27, %s1418_s10 }
 0x200   : > { %s1218_s30 = sshll.u32 %s1215_s22, 4  ;;  %s1697_s23 = scalar_lea.hbm %s2348_s12, 128  ;;  %s1219_s30 = int_to_ptr.hbm [resolvable:$true] %s1218_s30 }
 0x201   : > { %s1691_s19 = sshra.s32 %s1219_s30, 4  ;;  %s1692_s19 = int_to_ptr.hbm [resolvable:$true] %s1691_s19 }
 0x202   : > { %s1693_s15 = scalar_lea.hbm %s1692_s19, 32  ;;  %p1698_p11 = scmp.lt.s32.totalorder %s1692_s19, %s2348_s12 }
 0x203   : > { %p1694_p7 = scmp.ne.s32.totalorder %s1692_s19, %s1693_s15  ;;  %p1699_p13 = scmp.lt.s32.totalorder %s1697_s23, %s1693_s15 }
 0x205   : > { %p1695_p9 = pnand %p1694_p7, %p1929_p12  ;;  %p1700_p0 = por %p1699_p13, %p1698_p11 }
 0x207   : > { %p1696_p10 = pneg %p1695_p9 }
 0x209   : > { %p1701_p1 = pnand %p1700_p0, %p1696_p10 }
 0x20f   : > { %1385 = vmatmul.msk.bf16.gmra.mxu0 %vm745_vm3, %v1429_v24  ;;  %1393 = vmatmul.msk.bf16.gmra.mxu1 %vm745_vm3, %v1429_v24 }
 0x21f   : > { %1386 = vmatmul.msk.bf16.gmra.mxu0 %vm745_vm3, %v1430_v25  ;;  %1394 = vmatmul.msk.bf16.gmra.mxu1 %vm745_vm3, %v1430_v25 }
 0x22f   : > { %1387 = vmatmul.msk.bf16.gmra.mxu0 %vm745_vm3, %v1431_v26  ;;  %1395 = vmatmul.msk.bf16.gmra.mxu1 %vm745_vm3, %v1431_v26 }
 0x23f   : > { %1388 = vmatmul.msk.bf16.gmra.mxu0 %vm745_vm3, %v1432_v27  ;;  %1396 = vmatmul.msk.bf16.gmra.mxu1 %vm745_vm3, %v1432_v27 }
 0x24f   : > { %1389 = vmatmul.msk.bf16.gmra.mxu0 %vm745_vm3, %v1433_v28  ;;  %1397 = vmatmul.msk.bf16.gmra.mxu1 %vm745_vm3, %v1433_v28 }
 0x25f   : > { %1390 = vmatmul.msk.bf16.gmra.mxu0 %vm745_vm3, %v1434_v29  ;;  %1398 = vmatmul.msk.bf16.gmra.mxu1 %vm745_vm3, %v1434_v29 }
 0x26f   : > { %1391 = vmatmul.msk.bf16.gmra.mxu0 %vm745_vm3, %v1435_v30  ;;  %1399 = vmatmul.msk.bf16.gmra.mxu1 %vm745_vm3, %v1435_v30 }
 0x27c   : > { %v2053_v31 = vpop.f32.mrf.mxu0  ;;  %v2055_v32 = vpop.f32.mrf.mxu1 }
 0x27d   : > { %v875_v3 = vmax.f32 %v2053_v31, %v2055_v32 }
 0x284   : > { %v2057_v33 = vpop.f32.mrf.mxu0  ;;  %v2059_v34 = vpop.f32.mrf.mxu1 }
 0x285   : > { %v878_v14 = vmax.f32 %v2057_v33, %v2059_v34 }
 0x28c   : > { %v2061_v35 = vpop.f32.mrf.mxu0  ;;  %v2063_v36 = vpop.f32.mrf.mxu1 }
 0x28d   : > { %v881_v13 = vmax.f32 %v2061_v35, %v2063_v36 }
 0x294   : > { %v2065_v37 = vpop.f32.mrf.mxu0  ;;  %v2067_v38 = vpop.f32.mrf.mxu1 }
 0x295   : > { %v884_v10 = vmax.f32 %v2065_v37, %v2067_v38 }
 0x29c   : > { %v2069_v39 = vpop.f32.mrf.mxu0  ;;  %v2071_v40 = vpop.f32.mrf.mxu1 }
 0x29d   : > { %v887_v9 = vmax.f32 %v2069_v39, %v2071_v40 }
 0x2a4   : > { %v2073_v41 = vpop.f32.mrf.mxu0  ;;  %v2075_v42 = vpop.f32.mrf.mxu1 }
 0x2a5   : > { %v890_v63 = vmax.f32 %v2073_v41, %v2075_v42 }
 0x2ac   : > { %v2077_v43 = vpop.f32.mrf.mxu0  ;;  %v2079_v44 = vpop.f32.mrf.mxu1 }
 0x2ad   : > { %v893_v59 = vmax.f32 %v2077_v43, %v2079_v44 }
 0x2b4   : > { %v2081_v45 = vpop.f32.mrf.mxu0  ;;  %v2083_v46 = vpop.f32.mrf.mxu1 }
 0x2b5   : > { %v896_v12 = vmax.f32 %v2081_v45, %v2083_v46 }
 0x2bc   : > { %v2085_v47 = vpop.f32.mrf.mxu0  ;;  %v2087_v48 = vpop.f32.mrf.mxu1 }
 0x2bd   : > { %v899_v11 = vmax.f32 %v2085_v47, %v2087_v48 }
 0x2c4   : > { %v2089_v49 = vpop.f32.mrf.mxu0  ;;  %v2091_v50 = vpop.f32.mrf.mxu1 }
 0x2c5   : > { %v902_v4 = vmax.f32 %v2089_v49, %v2091_v50 }
 0x2cc   : > { %v2093_v51 = vpop.f32.mrf.mxu0  ;;  %v2095_v52 = vpop.f32.mrf.mxu1 }
 0x2cd   : > { %v905_v53 = vmax.f32 %v2093_v51, %v2095_v52 }
 0x2cf   : > { %906 = vmax.xlane.f32.xlu2 %v905_v53 }
 0x2d4   : > { %v2099_v54 = vpop.f32.mrf.mxu0  ;;  %v2101_v55 = vpop.f32.mrf.mxu1 }
 0x2d5   : > { %v908_v56 = vmax.f32 %v2099_v54, %v2101_v55 }
 0x2d7   : > { %909 = vmax.xlane.f32.xlu2 %v908_v56 }
 0x2dc   : > { %v2105_v57 = vpop.f32.mrf.mxu0  ;;  %v2107_v58 = vpop.f32.mrf.mxu1 }
 0x2dd   : > { %v911_v60 = vmax.f32 %v2105_v57, %v2107_v58 }
 0x2df   : > { %894 = vmax.xlane.f32.xlu2 %v893_v59  ;;  %912 = vmax.xlane.f32.xlu1 %v911_v60 }
 0x2e4   : > { %v2113_v61 = vpop.f32.mrf.mxu0  ;;  %v2115_v62 = vpop.f32.mrf.mxu1 }
 0x2e5   : > { %v914_v0 = vmax.f32 %v2113_v61, %v2115_v62 }
 0x2e7   : > { %891 = vmax.xlane.f32.xlu2 %v890_v63  ;;  %915 = vmax.xlane.f32.xlu1 %v914_v0 }
 0x2ec   : > { %v821_v1 = vpop.f32.mrf.mxu0  ;;  %v870_v2 = vpop.f32.mrf.mxu1 }
 0x2ed   : > { %v917_v5 = vmax.f32 %v821_v1, %v870_v2 }
 0x2ef   : > { %876 = vmax.xlane.f32.xlu2 %v875_v3  ;;  %903 = vmax.xlane.f32.xlu1 %v902_v4 }
 0x2f0   : > { %918 = vmax.xlane.f32.xlu0 %v917_v5 }
 0x2f4   : > { %v823_v6 = vpop.f32.mrf.mxu0  ;;  %v872_v7 = vpop.f32.mrf.mxu1 }
 0x2f5   : > { %v920_v8 = vmax.f32 %v823_v6, %v872_v7 }
 0x2f7   : > { %888 = vmax.xlane.f32.xlu1 %v887_v9 }
 0x2f8   : > { %921 = vmax.xlane.f32.xlu0 %v920_v8 }
 0x2ff   : > { %885 = vmax.xlane.f32.xlu1 %v884_v10 }
 0x300   : > { %900 = vmax.xlane.f32.xlu0 %v899_v11 }
 0x308   : > { %897 = vmax.xlane.f32.xlu0 %v896_v12 }
 0x310   : > { %882 = vmax.xlane.f32.xlu0 %v881_v13 }
 0x318   : > { %879 = vmax.xlane.f32.xlu0 %v878_v14 }
 0x342   : > { %v2137_v15 = vpop.xlane.xlu2 %906 }
 0x34a   : > { %v2139_v16 = vpop.xlane.xlu2 %909 }
 0x352   : > { %v2141_v17 = vpop.xlane.xlu2 %894  ;;  %v913_v18 = vpop.xlane.xlu1 %912 }
 0x353   : > { %v935_v11 = vsub.f32 %v2077_v43, %v2141_v17 }
 0x35a   : > { %v2143_v19 = vpop.xlane.xlu2 %891  ;;  %v916_v20 = vpop.xlane.xlu1 %915 }
 0x362   : > { %v877_v21 = vpop.xlane.xlu2 %876  ;;  %v2145_v22 = vpop.xlane.xlu1 %903 }
 0x363   : > { %v923_v23 = vsub.f32 %v2053_v31, %v877_v21  ;;  %v924_v24 = vsub.f32 %v2055_v32, %v877_v21  ;;  %v919_v25 = vpop.xlane.xlu0 %918  ;;  %v949_v31 = vsub.f32 %v2113_v61, %v916_v20  ;;  %v950_v32 = vsub.f32 %v2115_v62, %v916_v20 }
 0x364   : > { %v951_v28 = vsub.f32 %v821_v1, %v919_v25  ;;  %v952_v29 = vsub.f32 %v870_v2, %v919_v25  ;;  %v947_v2 = vsub.f32 %v2105_v57, %v913_v18  ;;  %v946_v21 = vsub.f32 %v2101_v55, %v2139_v16 }
 0x365   : > { %v955_v26 = vmul.f32 1.442695, %v923_v23  ;;  %v957_v27 = vmul.f32 1.442695, %v924_v24  ;;  %v1007_v8 = vmul.f32 1.442695, %v949_v31 }
 0x366   : > { %v1011_v53 = vmul.f32 1.442695, %v951_v28  ;;  %v1013_v59 = vmul.f32 1.442695, %v952_v29  ;;  %v1003_v13 = vmul.f32 1.442695, %v947_v2 }
 0x367   : > { %1551 = vpow2.f32 %v955_v26  ;;  %v1001_v28 = vmul.f32 1.442695, %v946_v21 }
 0x368   : > { %1553 = vpow2.f32 %v957_v27 }
 0x369   : > { %1555 = vpow2.f32 %v1011_v53 }
 0x36a   : > { %v2149_v30 = vpop.xlane.xlu1 %888  ;;  %1557 = vpow2.f32 %v1013_v59 }
 0x36b   : > { %v922_v56 = vpop.xlane.xlu0 %921 }
 0x36c   : > { %v953_v60 = vsub.f32 %v823_v6, %v922_v56  ;;  %v954_v63 = vsub.f32 %v872_v7, %v922_v56  ;;  %v948_v6 = vsub.f32 %v2107_v58, %v913_v18  ;;  %v1009_v7 = vmul.f32 1.442695, %v950_v32 }
 0x36d   : > { %v2151_v0 = vpop.eup %1551  ;;  %v936_v58 = vsub.f32 %v2079_v44, %v2141_v17  ;;  %v943_v44 = vsub.f32 %v2093_v51, %v2137_v15  ;;  %v979_v17 = vmul.f32 1.442695, %v935_v11  ;;  %v941_v51 = vsub.f32 %v2089_v49, %v2145_v22 }
 0x36e   : > { %v2154_v3 = vpop.eup %1553  ;;  %v1015_v4 = vmul.f32 1.442695, %v953_v60  ;;  %v1017_v5 = vmul.f32 1.442695, %v954_v63  ;;  %v1005_v18 = vmul.f32 1.442695, %v948_v6 }
 0x36f   : > { %v1019_v1 = vadd.f32 %v2154_v3, %v2151_v0  ;;  %v2165_v12 = vpop.eup %1555  ;;  %v981_v25 = vmul.f32 1.442695, %v936_v58  ;;  %v995_v53 = vmul.f32 1.442695, %v943_v44  ;;  %v991_v32 = vmul.f32 1.442695, %v941_v51 }
 0x370   : > { %1559 = vpow2.f32 %v1015_v4  ;;  %v2167_v20 = vpop.eup %1557 }
 0x371   : > { %1020 = vadd.xlane.f32.xlu1 %v1019_v1  ;;  %1561 = vpow2.f32 %v1017_v5 }
 0x372   : > { %v886_v61 = vpop.xlane.xlu1 %885  ;;  %1563 = vpow2.f32 %v1007_v8  ;;  %v933_v8 = vsub.f32 %v2073_v41, %v2143_v19 }
 0x373   : > { %v929_v9 = vsub.f32 %v2065_v37, %v886_v61  ;;  %v930_v62 = vsub.f32 %v2067_v38, %v886_v61  ;;  %v901_v10 = vpop.xlane.xlu0 %900  ;;  %1565 = vpow2.f32 %v1009_v7  ;;  %v945_v38 = vsub.f32 %v2099_v54, %v2139_v16 }
 0x374   : > { %v944_v54 = vsub.f32 %v2095_v52, %v2137_v15  ;;  %v942_v52 = vsub.f32 %v2091_v50, %v2145_v22  ;;  %v939_v59 = vsub.f32 %v2085_v47, %v901_v10  ;;  %v940_v63 = vsub.f32 %v2087_v48, %v901_v10 }
 0x375   : > { %v967_v57 = vmul.f32 1.442695, %v929_v9  ;;  %v969_v14 = vmul.f32 1.442695, %v930_v62  ;;  %v999_v55 = vmul.f32 1.442695, %v945_v38  ;;  %v934_v9 = vsub.f32 %v2075_v42, %v2143_v19 }
 0x376   : > { %v2171_v37 = vpop.eup %1559  ;;  %v997_v56 = vmul.f32 1.442695, %v944_v54  ;;  %v993_v22 = vmul.f32 1.442695, %v942_v52  ;;  %v987_v4 = vmul.f32 1.442695, %v939_v59 }
 0x377   : > { %1567 = vpow2.f32 %v967_v57  ;;  %v2175_v43 = vpop.eup %1561  ;;  %v1085_v23 = vpack.c.bf16 %v2171_v37, %v2165_v12  ;;  %v989_v5 = vmul.f32 1.442695, %v940_v63  ;;  %v977_v19 = vmul.f32 1.442695, %v934_v9 }
 0x378   : > { %1569 = vpow2.f32 %v969_v14  ;;  %v1086_v24 = vpack.c.bf16 %v2175_v43, %v2167_v20  ;;  %v2187_v26 = vpop.eup %1563  ;;  %v975_v14 = vmul.f32 1.442695, %v933_v8 }
 0x379   : > { %1571 = vpow2.f32 %v1003_v13  ;;  %1107 = vmatpush.bf16.xpose.msra.mxu2 %v1085_v23  ;;  %v2189_v27 = vpop.eup %1565 }
 0x37a   : > { %1573 = vpow2.f32 %v1005_v18  ;;  %1126 = vmatpush.bf16.xpose.msra.mxu3 %v1086_v24 }
 0x37b   : > { %v898_v16 = vpop.xlane.xlu0 %897  ;;  %1575 = vpow2.f32 %v979_v17 }
 0x37c   : > { %1577 = vpow2.f32 %v981_v25  ;;  %v937_v10 = vsub.f32 %v2081_v45, %v898_v16 }
 0x37d   : > { %v2193_v29 = vpop.eup %1567  ;;  %1579 = vpow2.f32 %v999_v55 }
 0x37e   : > { %v2197_v15 = vpop.eup %1569  ;;  %1581 = vpow2.f32 %v1001_v28  ;;  %v983_v18 = vmul.f32 1.442695, %v937_v10  ;;  %v931_v28 = vsub.f32 %v2069_v39, %v2149_v30 }
 0x37f   : > { %v2200_v60 = vpop.eup %1571  ;;  %v1028_v49 = vadd.f32 %v2197_v15, %v2193_v29  ;;  %1583 = vpow2.f32 %v995_v53  ;;  %v932_v53 = vsub.f32 %v2071_v40, %v2149_v30 }
 0x380   : > { %v2205_v31 = vpop.eup %1573  ;;  %v1083_v50 = vpack.c.bf16 %v2187_v26, %v2200_v60  ;;  %1585 = vpow2.f32 %v997_v56  ;;  %v971_v63 = vmul.f32 1.442695, %v931_v28 }
 0x381   : > { %1029 = vadd.xlane.f32.xlu1 %v1028_v49  ;;  %v1084_v47 = vpack.c.bf16 %v2189_v27, %v2205_v31  ;;  %v2211_v48 = vpop.eup %1575  ;;  %1587 = vpow2.f32 %v991_v32  ;;  %v973_v32 = vmul.f32 1.442695, %v932_v53  ;;  %v1055_v40 = vadd.f32 %v2205_v31, %v2200_v60 }
 0x382   : > { %1108 = vmatpush.bf16.xpose.msra.mxu2 %v1083_v50  ;;  %v2213_v2 = vpop.eup %1577  ;;  %1589 = vpow2.f32 %v993_v22 }
 0x383   : > { %1127 = vmatpush.bf16.xpose.msra.mxu3 %v1084_v47  ;;  %v883_v1 = vpop.xlane.xlu0 %882  ;;  %v2219_v61 = vpop.eup %1579  ;;  %1591 = vpow2.f32 %v987_v4 }
 0x384   : > { %v927_v6 = vsub.f32 %v2061_v35, %v883_v1  ;;  %v928_v7 = vsub.f32 %v2063_v36, %v883_v1  ;;  %v2223_v62 = vpop.eup %1581  ;;  %1593 = vpow2.f32 %v989_v5  ;;  %v938_v35 = vsub.f32 %v2083_v46, %v898_v16 }
 0x385   : > { %v2226_v57 = vpop.eup %1583  ;;  %v1037_v36 = vadd.f32 %v2213_v2, %v2211_v48 }
 0x386   : > { %v963_v11 = vmul.f32 1.442695, %v927_v6  ;;  %v965_v13 = vmul.f32 1.442695, %v928_v7  ;;  %v2231_v41 = vpop.eup %1585  ;;  %v1081_v42 = vpack.c.bf16 %v2219_v61, %v2226_v57  ;;  %v985_v38 = vmul.f32 1.442695, %v938_v35 }
 0x387   : > { %v1082_v45 = vpack.c.bf16 %v2223_v62, %v2231_v41  ;;  %v1588_v58 = vpop.eup %1587  ;;  %v1064_v6 = vadd.f32 %v2175_v43, %v2171_v37  ;;  %v1061_v37 = vadd.f32 %v2167_v20, %v2165_v12  ;;  %v1436_v35 = vld [vmem:[#allocation4 + $0x4] sm:$0xf]  ;;  %v1404_v12 = vld [vmem:[#allocation4 + $0x8] sm:$0xf0] }
 0x388   : > { %1595 = vpow2.f32 %v963_v11  ;;  %v1590_v46 = vpop.eup %1589  ;;  %v1407_v20 = vor.u32 %v1436_v35, %v1404_v12 }
 0x389   : > { %1597 = vpow2.f32 %v965_v13  ;;  %1038 = vadd.xlane.f32.xlu1 %v1037_v36  ;;  %v1592_v23 = vpop.eup %1591  ;;  %v1046_v51 = vadd.f32 %v1590_v46, %v1588_v58 }
 0x38a   : > { %1109 = vmatpush.bf16.xpose.msra.mxu2 %v1081_v42  ;;  %1599 = vpow2.f32 %v975_v14  ;;  %v1594_v24 = vpop.eup %1593  ;;  %v1079_v52 = vpack.c.bf16 %v1588_v58, %v1592_v23  ;;  %v1438_v14 = vld [vmem:[#allocation4 + $0x14] sm:$0xf] }
 0x38b   : > { %1128 = vmatpush.bf16.xpose.msra.mxu3 %v1082_v45  ;;  %v880_v21 = vpop.xlane.xlu0 %879  ;;  %1601 = vpow2.f32 %v977_v19  ;;  %v1043_v9 = vadd.f32 %v1594_v24, %v1592_v23  ;;  %v1412_v19 = vld [vmem:[#allocation4 + $0x18] sm:$0xf0] }
 0x38c   : > { %v925_v44 = vsub.f32 %v2057_v33, %v880_v21  ;;  %v926_v17 = vsub.f32 %v2059_v34, %v880_v21  ;;  %1603 = vpow2.f32 %v983_v18  ;;  %v1080_v34 = vpack.c.bf16 %v1590_v46, %v1594_v24 }
 0x38d   : > { %1605 = vpow2.f32 %v985_v38  ;;  %v1415_v45 = vor.u32 %v1438_v14, %v1412_v19 }
 0x38e   : > { %v1596_v54 = vpop.eup %1595  ;;  %v959_v25 = vmul.f32 1.442695, %v925_v44  ;;  %v961_v55 = vmul.f32 1.442695, %v926_v17 }
 0x38f   : > { %v1598_v16 = vpop.eup %1597 }
 0x390   : > { %1607 = vpow2.f32 %v959_v25  ;;  %v1025_v33 = vadd.f32 %v1598_v16, %v1596_v54  ;;  %v1600_v56 = vpop.eup %1599  ;;  %v1074_v10 = vpack.c.bf16 %v2197_v15, %v1598_v16  ;;  %v1058_v15 = vadd.f32 %v2189_v27, %v2187_v26 }
 0x391   : > { %1609 = vpow2.f32 %v961_v55  ;;  %1047 = vadd.xlane.f32.xlu1 %v1046_v51  ;;  %v1602_v59 = vpop.eup %1601 }
 0x392   : > { %1110 = vmatpush.bf16.xpose.msra.mxu2 %v1079_v52  ;;  %1026 = vadd.xlane.f32.xlu0 %v1025_v33  ;;  %v1604_v49 = vpop.eup %1603  ;;  %1611 = vpow2.f32 %v971_v63  ;;  %v1034_v47 = vadd.f32 %v1602_v59, %v1600_v56 }
 0x393   : > { %1129 = vmatpush.bf16.xpose.msra.mxu3 %v1080_v34  ;;  %v1606_v39 = vpop.eup %1605  ;;  %1613 = vpow2.f32 %v973_v32  ;;  %v1077_v30 = vpack.c.bf16 %v1604_v49, %v2211_v48  ;;  %v1073_v48 = vpack.c.bf16 %v2193_v29, %v1596_v54  ;;  %v1049_v29 = vadd.f32 %v2231_v41, %v2226_v57  ;;  %v1410_v57 = vld [vmem:[#allocation4 + $0x10] sm:$0xf]  ;;  %v1439_v41 = vld [vmem:[#allocation4 + $0x14] sm:$0xf0] }
 0x394   : > { %v1078_v5 = vpack.c.bf16 %v1606_v39, %v2213_v2  ;;  %v1052_v2 = vadd.f32 %v2223_v62, %v2219_v61  ;;  %v1040_v11 = vadd.f32 %v1606_v39, %v1604_v49  ;;  %v1402_v61 = vld [vmem:[#allocation4] sm:$0xf]  ;;  %v1437_v62 = vld [vmem:[#allocation4 + $0x4] sm:$0xf0]  ;;  %v1411_v42 = vor.u32 %v1439_v41, %v1410_v57 }
 0x395   : > { %v1403_v36 = vor.u32 %v1437_v62, %v1402_v61 }
 0x396   : > { %v1608_v50 = vpop.eup %1607 }
 0x397   : > { %v1610_v22 = vpop.eup %1609  ;;  %v1071_v43 = vpack.c.bf16 %v1608_v50, %v2151_v0 }
 0x398   : > { %v1022_v4 = vadd.f32 %v1610_v22, %v1608_v50  ;;  %v1612_v1 = vpop.eup %1611  ;;  %v1072_v13 = vpack.c.bf16 %v1610_v22, %v2154_v3 }
 0x399   : > { %1056 = vadd.xlane.f32.xlu1 %v1055_v40  ;;  %v1614_v8 = vpop.eup %1613  ;;  %v1075_v7 = vpack.c.bf16 %v1600_v56, %v1612_v1 }
 0x39a   : > { %1111 = vmatpush.bf16.xpose.msra.mxu2 %v1077_v30  ;;  %1035 = vadd.xlane.f32.xlu0 %v1034_v47  ;;  %v1076_v60 = vpack.c.bf16 %v1602_v59, %v1614_v8  ;;  %v1031_v31 = vadd.f32 %v1614_v8, %v1612_v1 }
 0x39b   : > { %1130 = vmatpush.bf16.xpose.msra.mxu3 %v1078_v5  ;;  %1023 = vadd.xlane.f32.xlu2 %v1022_v4 }
 0x3a1   : > { %1065 = vadd.xlane.f32.xlu1 %v1064_v6 }
 0x3a2   : > { %1112 = vmatpush.bf16.xpose.msra.mxu2 %v1075_v7  ;;  %1044 = vadd.xlane.f32.xlu0 %v1043_v9 }
 0x3a3   : > { %1131 = vmatpush.bf16.xpose.msra.mxu3 %v1076_v60  ;;  %1032 = vadd.xlane.f32.xlu2 %v1031_v31 }
 0x3aa   : > { %1113 = vmatpush.bf16.xpose.msra.mxu2 %v1073_v48  ;;  %1053 = vadd.xlane.f32.xlu0 %v1052_v2 }
 0x3ab   : > { %1132 = vmatpush.bf16.xpose.msra.mxu3 %v1074_v10  ;;  %1041 = vadd.xlane.f32.xlu2 %v1040_v11 }
 0x3b2   : > { %1062 = vadd.xlane.f32.xlu0 %v1061_v37  ;;  %1114 = vmatpush.bf16.xpose.msra.mxu2 %v1071_v43 }
 0x3b3   : > { %1133 = vmatpush.bf16.xpose.msra.mxu3 %v1072_v13  ;;  %1050 = vadd.xlane.f32.xlu2 %v1049_v29 }
 0x3b9   : > { %1115 = vmatmul.bf16.vlgmr.msra.gmra.mxu2 %v1403_v36 }
 0x3ba   : > { %1134 = vmatmul.bf16.vlgmr.msra.gmra.mxu3 %v1407_v20 }
 0x3bb   : > { %1059 = vadd.xlane.f32.xlu2 %v1058_v15 }
 0x3c9   : > { %1120 = vmatmul.bf16.gmra.mxu2 %v1411_v42 }
 0x3ca   : > { %1139 = vmatmul.bf16.gmra.mxu3 %v1415_v45 }
 0x3e4   : > { %v1021_v0 = vpop.xlane.xlu1 %1020 }
 0x3e5   : > { %1615 = vrcp.f32 %v1021_v0 }
 0x3eb   : > { %v1616_v3 = vpop.eup %1615 }
 0x3ec   : > { %1161 = vxpose.xlu2.b32.start [1/16] (narrow) %v1616_v3, 8 }
 0x3f4   : > { %v1030_v18 = vpop.xlane.xlu1 %1029 }
 0x3fc   : > { %v1039_v17 = vpop.xlane.xlu1 %1038 }
 0x404   : > { %v1048_v28 = vpop.xlane.xlu1 %1047 }
 0x405   : > { %v1027_v27 = vpop.xlane.xlu0 %1026 }
 0x40c   : > { %v1057_v56 = vpop.xlane.xlu1 %1056 }
 0x40d   : > { %v1036_v23 = vpop.xlane.xlu0 %1035 }
 0x40e   : > { %v1024_v26 = vpop.xlane.xlu2 %1023 }
 0x40f   : > { %1617 = vrcp.f32 %v1024_v26 }
 0x410   : > { %1619 = vrcp.f32 %v1027_v27 }
 0x411   : > { %1621 = vrcp.f32 %v1030_v18 }
 0x414   : > { %v1066_v50 = vpop.xlane.xlu1 %1065 }
 0x415   : > { %v1618_v58 = vpop.eup %1617  ;;  %v1045_v55 = vpop.xlane.xlu0 %1044 }
 0x416   : > { %1162 = vxpose.xlu2.b32.cont [2/16] (narrow) %v1618_v58, 8  ;;  %v1620_v46 = vpop.eup %1619  ;;  %v1033_v38 = vpop.xlane.xlu2 %1032 }
 0x417   : > { %v1622_v21 = vpop.eup %1621  ;;  %1623 = vrcp.f32 %v1033_v38 }
 0x418   : > { %1625 = vrcp.f32 %v1036_v23 }
 0x419   : > { %1627 = vrcp.f32 %v1039_v17 }
 0x41d   : > { %v1624_v44 = vpop.eup %1623  ;;  %v1054_v33 = vpop.xlane.xlu0 %1053 }
 0x41e   : > { %1163 = vxpose.xlu2.b32.cont [3/16] (narrow) %v1620_v46, 8  ;;  %v1626_v24 = vpop.eup %1625  ;;  %v1042_v54 = vpop.xlane.xlu2 %1041 }
 0x41f   : > { %v1628_v25 = vpop.eup %1627  ;;  %1629 = vrcp.f32 %v1042_v54 }
 0x420   : > { %1631 = vrcp.f32 %v1045_v55 }
 0x421   : > { %1633 = vrcp.f32 %v1048_v28 }
 0x425   : > { %v1630_v16 = vpop.eup %1629  ;;  %v1063_v32 = vpop.xlane.xlu0 %1062 }
 0x426   : > { %1164 = vxpose.xlu2.b32.cont [4/16] (narrow) %v1622_v21, 8  ;;  %v1632_v51 = vpop.eup %1631  ;;  %v1051_v53 = vpop.xlane.xlu2 %1050 }
 0x427   : > { %v1634_v52 = vpop.eup %1633  ;;  %1635 = vrcp.f32 %v1051_v53 }
 0x428   : > { %1637 = vrcp.f32 %v1054_v33 }
 0x429   : > { %1639 = vrcp.f32 %v1057_v56 }
 0x42d   : > { %v1636_v34 = vpop.eup %1635 }
 0x42e   : > { %1165 = vxpose.xlu2.b32.cont [5/16] (narrow) %v1624_v44, 8  ;;  %v1638_v59 = vpop.eup %1637  ;;  %v1060_v63 = vpop.xlane.xlu2 %1059 }
 0x42f   : > { %v1640_v49 = vpop.eup %1639  ;;  %1641 = vrcp.f32 %v1060_v63 }
 0x430   : > { %1643 = vrcp.f32 %v1063_v32 }
 0x431   : > { %1645 = vrcp.f32 %v1066_v50 }
 0x435   : > { %v1642_v39 = vpop.eup %1641 }
 0x436   : > { %1166 = vxpose.xlu2.b32.cont [6/16] (narrow) %v1626_v24, 8  ;;  %v1644_v22 = vpop.eup %1643 }
 0x437   : > { %v1646_v40 = vpop.eup %1645 }
 0x43c   : > { %v1116_v30 = vpop.f32.mrf.mxu2 }
 0x43d   : > { %v1135_v47 = vpop.f32.mrf.mxu3 }
 0x43e   : > { %1167 = vxpose.xlu2.b32.cont [7/16] (narrow) %v1628_v25, 8  ;;  %v1136_v60 = vadd.f32 %v1135_v47, %v1116_v30 }
 0x444   : > { %v1118_v4 = vpop.f32.mrf.mxu2 }
 0x445   : > { %v1137_v5 = vpop.f32.mrf.mxu3 }
 0x446   : > { %1168 = vxpose.xlu2.b32.cont [8/16] (narrow) %v1630_v16, 8  ;;  %v1138_v31 = vadd.f32 %v1137_v5, %v1118_v4 }
 0x44c   : > { %v1121_v1 = vpop.f32.mrf.mxu2 }
 0x44d   : > { %v1140_v8 = vpop.f32.mrf.mxu3 }
 0x44e   : > { %1169 = vxpose.xlu2.b32.cont [9/16] (narrow) %v1632_v51, 8  ;;  %v1141_v48 = vadd.f32 %v1140_v8, %v1121_v1 }
 0x454   : > { %v1123_v6 = vpop.f32.mrf.mxu2 }
 0x455   : > { %v1142_v7 = vpop.f32.mrf.mxu3 }
 0x456   : > { %1170 = vxpose.xlu2.b32.cont [10/16] (narrow) %v1634_v52, 8  ;;  %v1143_v10 = vadd.f32 %v1142_v7, %v1123_v6 }
 0x45e   : > { %1171 = vxpose.xlu2.b32.cont [11/16] (narrow) %v1636_v34, 8 }
 0x466   : > { %1172 = vxpose.xlu2.b32.cont [12/16] (narrow) %v1638_v59, 8 }
 0x46e   : > { %1173 = vxpose.xlu2.b32.cont [13/16] (narrow) %v1640_v49, 8 }
 0x476   : > { %1174 = vxpose.xlu2.b32.cont [14/16] (narrow) %v1642_v39, 8 }
 0x47e   : > { %1175 = vxpose.xlu2.b32.cont [15/16] (narrow) %v1644_v22, 8 }
 0x486   : > { %1176 = vxpose.xlu2.b32.end [16/16] (narrow) %v1646_v40, 8 }
 0x4a7   : > { %v1177_v9 = vpop.trf.xlu2 }
 0x4a8   : > { %v1193_v2 = vperm.slane %v1177_v9, 0 }
 0x4aa   : > { %v1194_v11 = vmul.f32 %v1193_v2, %v1136_v60  ;;  %v1195_v37 = vmul.f32 %v1193_v2, %v1138_v31  ;;  %v1196_v43 = vmul.f32 %v1193_v2, %v1141_v48  ;;  %v1197_v13 = vmul.f32 %v1193_v2, %v1143_v10 }
 0x4ac   : > { %1198 = vst [vmem:[%s1963_s7] sm:$0xff] %v1194_v11 }
 0x4ad   : > { %1199 = vst [vmem:[%s1963_s7 + $0x8] sm:$0xff] %v1195_v37 }
 0x4ae   : > { %1200 = vst [vmem:[%s1963_s7 + $0x10] sm:$0xff] %v1196_v43 }
 0x4af   : > { %1201 = vst [vmem:[%s1963_s7 + $0x18] sm:$0xff] %v1197_v13 }
 0x4b0   : > { %1704 = shalt.err (!%p1701_p1)
}
 0x4b1   : > { %s1804_s17 = smov 128   ;;  %s1805_s7 = smov 256  }
 0x4b2   : > { %s1806_s20 = smov 8  }
 0x4b3   : > { %1442 = dma.vmem_to_hbm [thread:$0]  (%p1929_p12), %s1217_s16, 512, %s1219_s30, %s1203_s13, %s1804_s17, %s1805_s7, %s1806_s20  }
 0x4b4 PF: > { %p1453_p4 = scmp.ge.s32.totalorder %s1799_s11, 2  ;;  %s1233_s27 = sand.u32 1, %s1759_s24  }
 0x4b5   : > { %s1234_s22 = scalar_lea.sflag [#allocation7], %s1233_s27 }
 0x4b6   : > { %p1449_p5 = pnand %p1453_p4, %p1942_p2 }
 0x4b8   : > { %p1450_p6 = pneg %p1449_p5 }
 0x4ba   : > { %1754 = dma.done.wait (%p1450_p6), %s1234_s22, 512  }
 0x4bb   : > { %1756 = vsyncadd (%p1450_p6), %s1234_s22, 4294966784  ;;  %s23_s11 = sadd.s32 1, %s1799_s11   ;;  %s2350_s19 = sld [smem:[#allocation17_spill]] }
 0x4bc   : > { %p20_p8 = scmp.ge.s32.totalorder %s23_s11, 6   ;;  %s2351_s16 = sld [smem:[#allocation16_spill]] }
 0x4bd   : > { %s2352_s30 = sld [smem:[#allocation11_spill]]  ;;  %s2356_s24 = smov %s1763_s25 }
 0x4be   : > { %s2353_s8 = sld [smem:[#allocation12_spill]]  ;;  %s2357_s25 = smov %s1767_s26 }
 0x4bf   : > { %s2354_s9 = sld [smem:[#allocation13_spill]]  ;;  %s2359_s27 = smov %s1775_s28 }
 0x4c0   : > { %s2355_s10 = sld [smem:[#allocation14_spill]]  ;;  %s2360_s28 = smov %s1779_s29 }
 0x4c1   : > { %s2358_s26 = smov %s2350_s19  ;;  %22 = sbr.rel (!%p20_p8) target bundleno = 11 (0xb), region = 98 }
 0x4c2   : > { %s2361_s29 = smov %s2351_s16 }
 0x4c6   :  { %1240 = vsyncpa [#allocation6], 1 }
 0x4c7   :  { %1242 = vsyncpa [#allocation6 + $0x1], 1 }
 0x4c8   :  { %1243 = vsyncpa [#allocation7], 1 }
 0x4c9   :  { %1245 = vsyncpa [#allocation7 + $0x1], 1 }

</bundles_post_ra>
